<compile_context>
chip_gen: v6e
topology: v6e:2x2x1
jax: 0.10.0
libtpu: 0.0.40
codegen_flags: <defaults>
</compile_context>

<pallas_src>
import functools

import jax
import jax.numpy as jnp
from jax.experimental import pallas as pl
from jax.experimental.pallas import tpu as pltpu

_LANE = 128          # TPU vreg lane width
_SUBLANE_F32 = 8     # f32 sublanes per vreg
_SUBLANE_BF16 = 16   # bf16 packs 16 sublanes per vreg


def _ceil_to(n, m):
    return ((n + m - 1) // m) * m


def _pad_axis(a, target, axis):
    pad = target - a.shape[axis]
    if pad <= 0:
        return a
    widths = [(0, 0)] * a.ndim
    widths[axis] = (0, pad)
    return jnp.pad(a, widths)


def _pick_tile(total, pref):
    """Largest multiple of 128 that divides `total` and is <= pref."""
    t = min(pref, total)
    t = max(_LANE, (t // _LANE) * _LANE)
    while t > _LANE and total % t != 0:
        t -= _LANE
    return t


def _chip_info():
    """(num_tensorcores, wide_mxu, vmem_limit_bytes) — generation aware, safe fallbacks."""
    kind = ""
    try:
        kind = jax.devices()[0].device_kind.lower()
    except Exception:
        pass
    n_tc = 2 if ("v7" in kind or "7x" in kind) else 1      # v7x: 2 TensorCores/chip
    wide_mxu = "v5" not in kind                             # v6e/v7x: 2x256^2 MXU
    try:
        cap = pltpu.get_tpu_info().vmem_capacity_bytes
        vmem_limit = int(cap * 3 // 4)                      # ~48 MiB on v7x, ~96 MiB on v5e/v6e
    except Exception:
        vmem_limit = 32 * 1024 * 1024                       # conservative fallback
    return n_tc, wide_mxu, vmem_limit


def _encoder_kernel(patches_ref, w_e_ref, bvec_ref, w1_ref, b1_ref, w2_ref,
                    wn_ref, bn_ref, out_ref, tok_sc, h_sc, mlp_sc,
                    *, d_true, eps=1e-6):
    """Row-tile SAM2-style encoder with a hidden-dim reduction grid axis.

    Grid = (row tiles, hidden tiles).  At hidden step 0 the patch embedding and
    LayerNorm are computed and cached in VMEM scratch; every hidden step streams
    one (Dp, tk_h)/(tk_h, Dp) slab of w1/w2 through the MXU into a f32
    accumulator; the last step adds the residual and applies the neck.

    All channel dims are zero-padded to 128-lane multiples in the wrapper, so
    every matmul and the output store are lane-dense.  LayerNorm statistics use
    the TRUE channel count `d_true`; padded gamma/beta/weight rows/cols are
    zero, so the math is exact.  Matmul operands are bf16 (MXU), accumulation
    and all elementwise math are f32.
    """
    k = pl.program_id(1)

    @pl.when(k == 0)
    def _():
        # Patch embedding (stride-P conv == matmul over flattened patches).
        tok = jnp.dot(patches_ref[...], w_e_ref[...],
                      preferred_element_type=jnp.float32) + bvec_ref[0:1, :]
        # LayerNorm over the TRUE channel count — single pass, clamped variance.
        inv_d = jnp.float32(1.0 / d_true)
        mu = jnp.sum(tok, axis=-1, keepdims=True) * inv_d
        ex2 = jnp.sum(tok * tok, axis=-1, keepdims=True) * inv_d
        var = jnp.maximum(ex2 - mu * mu, 0.0)
        h = (tok - mu) * jax.lax.rsqrt(var + eps)
        h = h * bvec_ref[1:2, :] + bvec_ref[2:3, :]   # gamma/beta (zero on pads)
        tok_sc[...] = tok
        h_sc[...] = h.astype(h_sc.dtype)
        mlp_sc[...] = jnp.zeros_like(mlp_sc)

    # MLP hidden-tile step: h @ w1[:, tile] -> GELU -> @ w2[tile, :] (accumulate).
    # TODO(synk): tanh-approx GELU; PyTorch nn.GELU default is the exact erf form.
    h1 = jnp.dot(h_sc[...], w1_ref[...],
                 preferred_element_type=jnp.float32) + b1_ref[...]
    h1 = jax.nn.gelu(h1, approximate=True)
    mlp_sc[...] += jnp.dot(h1.astype(jnp.bfloat16), w2_ref[...],
                           preferred_element_type=jnp.float32)

    @pl.when(k == pl.num_programs(1) - 1)
    def _():
        tok = tok_sc[...] + mlp_sc[...] + bvec_ref[3:4, :]   # residual (+ b2 once)
        # Neck: 1x1 conv == channel projection matmul.
        out = jnp.dot(tok.astype(jnp.bfloat16), wn_ref[...],
                      preferred_element_type=jnp.float32) + bn_ref[...]
        out_ref[...] = out.astype(out_ref.dtype)


def init_params(key, in_ch=3, patch=4, dim=32, hidden=64, out_dim=32):
    """Deterministic synthetic encoder parameters (stand-in for a checkpoint)."""
    k = jax.random.split(key, 6)
    kk = in_ch * patch * patch
    s = lambda fan: 1.0 / jnp.sqrt(jnp.float32(fan))
    return dict(
        w_embed=jax.random.normal(k[0], (kk, dim), jnp.float32) * s(kk),
        b_embed=jnp.zeros((1, dim), jnp.float32),
        gamma=jnp.ones((1, dim), jnp.float32),
        beta=jnp.zeros((1, dim), jnp.float32),
        w1=jax.random.normal(k[1], (dim, hidden), jnp.float32) * s(dim),
        b1=jnp.zeros((1, hidden), jnp.float32),
        w2=jax.random.normal(k[2], (hidden, dim), jnp.float32) * s(hidden),
        b2=jnp.zeros((1, dim), jnp.float32),
        w_neck=jax.random.normal(k[3], (dim, out_dim), jnp.float32) * s(dim),
        b_neck=jnp.zeros((1, out_dim), jnp.float32),
    )


def sam2_forward_image(x, params, patch=4):
    """Synthetic core_model.forward_image: returns a tuple (features, pos)."""
    B, C, H, W = x.shape
    Hp, Wp = H // patch, W // patch
    T = Hp * Wp
    K = C * patch * patch
    D = params["w_embed"].shape[1]
    Hm = params["w1"].shape[1]
    Dout = params["w_neck"].shape[1]

    # ---- Patchify glue in bf16 (halves the bytes moved by the strided transpose).
    # TODO(synk): at real image sizes fold patch extraction into the kernel via a
    # strided/Element index_map instead of a separate XLA gather pass.
    xp = x.astype(jnp.bfloat16).reshape(B, C, Hp, patch, Wp, patch)
    xp = xp.transpose(0, 2, 4, 1, 3, 5).reshape(B * T, K)

    # ---- Lane-pad all channel dims to multiples of 128 (zero padding is exact).
    Kp = _ceil_to(K, _LANE)
    Dp = _ceil_to(D, _LANE)
    Hmp = _ceil_to(Hm, _LANE)
    Dop = _ceil_to(Dout, _LANE)

    n_tc, wide_mxu, vmem_limit = _chip_info()

    # ---- Row tile: 256 fills v6e/v7x MXUs at scale; at small M split rows only
    # on 2-TC chips (v7x); always a multiple of 16 sublanes (bf16 packing).
    M = B * T
    if M >= 256:
        tm = 256 if (wide_mxu and M % 256 == 0) else 128
        Mp = _ceil_to(M, tm)
    elif n_tc > 1 and M > _SUBLANE_BF16:
        tm = _ceil_to(max(_SUBLANE_BF16, -(-M // n_tc)), _SUBLANE_BF16)
        Mp = _ceil_to(M, tm)
    else:
        tm = _ceil_to(M, _SUBLANE_BF16)    # single-TC chips: one tile, no step overhead
        Mp = tm
    # Hidden reduction tile: bounds w1/w2 residency so real dims fit v7x's 64 MiB/TC.
    tk_h = _pick_tile(Hmp, 512 if wide_mxu else 256)
    nk = Hmp // tk_h

    rows = _pad_axis(_pad_axis(xp, Kp, 1), Mp, 0)

    def pad_w(w, r, c):
        return _pad_axis(_pad_axis(w, r, 0), c, 1).astype(jnp.bfloat16)

    w_e = pad_w(params["w_embed"], Kp, Dp)
    w1 = pad_w(params["w1"], Dp, Hmp)
    w2 = pad_w(params["w2"], Hmp, Dp)
    wn = pad_w(params["w_neck"], Dp, Dop)

    # Pack the four D-wide bias/affine vectors into one (8, Dp) block:
    # row 0 = b_embed, 1 = gamma, 2 = beta, 3 = b2 (padded rows/lanes stay zero).
    bvec = jnp.zeros((_SUBLANE_F32, Dp), jnp.float32)
    bvec = bvec.at[0, :D].set(params["b_embed"][0])
    bvec = bvec.at[1, :D].set(params["gamma"][0])
    bvec = bvec.at[2, :D].set(params["beta"][0])
    bvec = bvec.at[3, :D].set(params["b2"][0])
    b1 = _pad_axis(params["b1"], Hmp, 1).astype(jnp.float32)
    bn = _pad_axis(params["b_neck"], Dop, 1).astype(jnp.float32)

    # Grid-invariant blocks are single-buffered: double-buffering them only
    # doubles their VMEM footprint (the critical budget on v7x, per-TC).
    def const(shape):
        return pl.BlockSpec(shape, lambda i, k: (0, 0), pipeline_mode=pl.Buffered(1))

    # w1/w2/b1 step along the hidden axis: double-buffer only if it has >1 step.
    hid_mode = pl.Buffered(2) if nk > 1 else pl.Buffered(1)

    tokens = pl.pallas_call(
        functools.partial(_encoder_kernel, d_true=D),
        out_shape=jax.ShapeDtypeStruct((Mp, Dop), jnp.float32),
        grid_spec=pltpu.PrefetchScalarGridSpec(
            num_scalar_prefetch=0,
            grid=(Mp // tm, nk),
            in_specs=[
                pl.BlockSpec((tm, Kp), lambda i, k: (i, 0)),              # patch rows
                const((Kp, Dp)),                                          # w_embed
                const((_SUBLANE_F32, Dp)),                                # b_embed/gamma/beta/b2
                pl.BlockSpec((Dp, tk_h), lambda i, k: (0, k),
                             pipeline_mode=hid_mode),                     # w1 tile
                pl.BlockSpec((1, tk_h), lambda i, k: (0, k),
                             pipeline_mode=hid_mode),                     # b1 tile
                pl.BlockSpec((tk_h, Dp), lambda i, k: (k, 0),
                             pipeline_mode=hid_mode),                     # w2 tile
                const((Dp, Dop)),                                         # w_neck
                const((1, Dop)),                                          # b_neck
            ],
            out_specs=pl.BlockSpec((tm, Dop), lambda i, k: (i, 0)),
            scratch_shapes=[
                pltpu.VMEM((tm, Dp), jnp.float32),    # tok (pre-MLP, residual source)
                pltpu.VMEM((tm, Dp), jnp.bfloat16),   # LayerNorm output (MXU LHS)
                pltpu.VMEM((tm, Dp), jnp.float32),    # MLP accumulator
            ]),
        compiler_params=pltpu.CompilerParams(
            dimension_semantics=("parallel", "arbitrary"),
            vmem_limit_bytes=vmem_limit,
        ),
    )(rows, w_e, bvec, w1, b1, w2, wn, bn)

    # Tokens -> NCHW feature map: slice the TRUE channels before the transpose
    # so the permute moves the minimum number of bytes.
    fmap = tokens[:M, :Dout].reshape(B, Hp, Wp, Dout).transpose(0, 3, 1, 2)
    pos = jnp.zeros_like(fmap)          # placeholder positional encoding
    return (fmap, pos)


def sam2_forward_wrapper(x, params):
    """Mirrors SAM2ForwardWrapper.forward control flow exactly."""
    backbone_out = sam2_forward_image(x, params)
    if isinstance(backbone_out, tuple) and len(backbone_out) > 0:
        return backbone_out[0]
    elif isinstance(backbone_out, jnp.ndarray):
        return backbone_out
    else:
        return jnp.zeros((x.shape[0], 1), dtype=jnp.float32)


if __name__ == "__main__":
    key = jax.random.PRNGKey(0)
    k_x, k_p = jax.random.split(key)

    # Small SAM2-like input: batch=2, 3-channel image, 16x16 spatial.
    x = jax.random.normal(k_x, (2, 3, 16, 16), dtype=jnp.float32)
    params = init_params(k_p, in_ch=3, patch=4, dim=32, hidden=64, out_dim=32)

    out = sam2_forward_wrapper(x, params)
    out = jax.block_until_ready(out)
    assert out.shape == (2, 32, 4, 4), out.shape
    assert bool(jnp.all(jnp.isfinite(out)))
    print("KERNEL_OK")
</pallas_src>

<mosaic_0001>
module attributes {stable_mosaic.version = 11 : i64} {
  func.func @_encoder_kernel(%arg0: i32, %arg1: i32, %arg2: memref<32x128xbf16, #tpu.memory_space<vmem>>, %arg3: memref<128x128xbf16, #tpu.memory_space<vmem>>, %arg4: memref<8x128xf32, #tpu.memory_space<vmem>>, %arg5: memref<128x128xbf16, #tpu.memory_space<vmem>>, %arg6: memref<1x128xf32, #tpu.memory_space<vmem>>, %arg7: memref<128x128xbf16, #tpu.memory_space<vmem>>, %arg8: memref<128x128xbf16, #tpu.memory_space<vmem>>, %arg9: memref<1x128xf32, #tpu.memory_space<vmem>>, %arg10: memref<32x128xf32, #tpu.memory_space<vmem>>, %arg11: memref<32x128xf32, #tpu.memory_space<vmem>>, %arg12: memref<32x128xbf16, #tpu.memory_space<vmem>>, %arg13: memref<32x128xf32, #tpu.memory_space<vmem>>) attributes {dimension_semantics = [#tpu.dimension_semantics<parallel>, #tpu.dimension_semantics<arbitrary>], iteration_bounds = array<i64: 1, 1>, scalar_prefetch = 0 : i64, scratch_operands = 3 : i64, tpu.core_type = #tpu.core_type<tc>, window_params = [{transform_indices = @transform_0, window_bounds = array<i64: 32, 128>}, {pipeline_mode = #tpu.pipeline_mode<synchronous>, transform_indices = @transform_1, window_bounds = array<i64: 128, 128>}, {pipeline_mode = #tpu.pipeline_mode<synchronous>, transform_indices = @transform_2, window_bounds = array<i64: 8, 128>}, {pipeline_mode = #tpu.pipeline_mode<synchronous>, transform_indices = @transform_3, window_bounds = array<i64: 128, 128>}, {pipeline_mode = #tpu.pipeline_mode<synchronous>, transform_indices = @transform_4, window_bounds = array<i64: 1, 128>}, {pipeline_mode = #tpu.pipeline_mode<synchronous>, transform_indices = @transform_5, window_bounds = array<i64: 128, 128>}, {pipeline_mode = #tpu.pipeline_mode<synchronous>, transform_indices = @transform_6, window_bounds = array<i64: 128, 128>}, {pipeline_mode = #tpu.pipeline_mode<synchronous>, transform_indices = @transform_7, window_bounds = array<i64: 1, 128>}, {transform_indices = @transform_8, window_bounds = array<i64: 32, 128>}]} {
    %c0_i32 = arith.constant 0 : i32
    %0 = arith.cmpi eq, %arg1, %c0_i32 : i32
    %1 = arith.extui %0 : i1 to i32
    %c0_i32_0 = arith.constant 0 : i32
    %2 = arith.cmpi ne, %1, %c0_i32_0 : i32
    scf.if %2 {
      %c0_19 = arith.constant 0 : index
      %c0_20 = arith.constant 0 : index
      %31 = vector.load %arg2[%c0_19, %c0_20] : memref<32x128xbf16, #tpu.memory_space<vmem>>, vector<32x128xbf16>
      %c0_21 = arith.constant 0 : index
      %c0_22 = arith.constant 0 : index
      %32 = vector.load %arg3[%c0_21, %c0_22] : memref<128x128xbf16, #tpu.memory_space<vmem>>, vector<128x128xbf16>
      %cst_23 = arith.constant dense<0.000000e+00> : vector<32x128xf32>
      %33 = tpu.matmul %31, %32, %cst_23 {dimension_numbers = #tpu.dot_dimension_numbers<[1], [0], [0], [1], [0, 0, 1, 1], [], []>} : vector<32x128xbf16>, vector<128x128xbf16>, vector<32x128xf32> -> vector<32x128xf32>
      %c0_24 = arith.constant 0 : index
      %c0_25 = arith.constant 0 : index
      %34 = vector.load %arg4[%c0_24, %c0_25] : memref<8x128xf32, #tpu.memory_space<vmem>>, vector<1x128xf32>
      %35 = vector.broadcast %34 : vector<1x128xf32> to vector<32x128xf32>
      %36 = arith.addf %33, %35 : vector<32x128xf32>
      %cst_26 = arith.constant dense<0.000000e+00> : vector<32xf32>
      %37 = vector.multi_reduction <add>, %36, %cst_26 [1] : vector<32x128xf32> to vector<32xf32>
      %38 = vector.shape_cast %37 : vector<32xf32> to vector<32x1xf32>
      %cst_27 = arith.constant 3.125000e-02 : f32
      %39 = vector.broadcast %cst_27 : f32 to vector<32x1xf32>
      %40 = arith.mulf %38, %39 : vector<32x1xf32>
      %41 = arith.mulf %36, %36 : vector<32x128xf32>
      %cst_28 = arith.constant dense<0.000000e+00> : vector<32xf32>
      %42 = vector.multi_reduction <add>, %41, %cst_28 [1] : vector<32x128xf32> to vector<32xf32>
      %43 = vector.shape_cast %42 : vector<32xf32> to vector<32x1xf32>
      %cst_29 = arith.constant 3.125000e-02 : f32
      %44 = vector.broadcast %cst_29 : f32 to vector<32x1xf32>
      %45 = arith.mulf %43, %44 : vector<32x1xf32>
      %46 = arith.mulf %40, %40 : vector<32x1xf32>
      %47 = arith.subf %45, %46 : vector<32x1xf32>
      %cst_30 = arith.constant 0.000000e+00 : f32
      %48 = vector.broadcast %cst_30 : f32 to vector<32x1xf32>
      %49 = arith.maximumf %47, %48 : vector<32x1xf32>
      %50 = vector.broadcast %40 : vector<32x1xf32> to vector<32x128xf32>
      %51 = arith.subf %36, %50 : vector<32x128xf32>
      %cst_31 = arith.constant 9.99999997E-7 : f32
      %52 = vector.broadcast %cst_31 : f32 to vector<32x1xf32>
      %53 = arith.addf %49, %52 : vector<32x1xf32>
      %54 = math.rsqrt %53 : vector<32x1xf32>
      %55 = vector.broadcast %54 : vector<32x1xf32> to vector<32x128xf32>
      %56 = arith.mulf %51, %55 : vector<32x128xf32>
      %c1 = arith.constant 1 : index
      %c0_32 = arith.constant 0 : index
      %57 = vector.load %arg4[%c1, %c0_32] : memref<8x128xf32, #tpu.memory_space<vmem>>, vector<1x128xf32>
      %58 = vector.broadcast %57 : vector<1x128xf32> to vector<32x128xf32>
      %59 = arith.mulf %56, %58 : vector<32x128xf32>
      %c2 = arith.constant 2 : index
      %c0_33 = arith.constant 0 : index
      %60 = vector.load %arg4[%c2, %c0_33] : memref<8x128xf32, #tpu.memory_space<vmem>>, vector<1x128xf32>
      %61 = vector.broadcast %60 : vector<1x128xf32> to vector<32x128xf32>
      %62 = arith.addf %59, %61 : vector<32x128xf32>
      %c0_34 = arith.constant 0 : index
      %c0_35 = arith.constant 0 : index
      %63 = vector.load %arg11[%c0_34, %c0_35] : memref<32x128xf32, #tpu.memory_space<vmem>>, vector<32x128xf32>
      tpu.vector_store %arg11[%c0_34, %c0_35], %36 {strides = array<i32>} : memref<32x128xf32, #tpu.memory_space<vmem>>, vector<32x128xf32>,
      %64 = arith.truncf %62 : vector<32x128xf32> to vector<32x128xbf16>
      %c0_36 = arith.constant 0 : index
      %c0_37 = arith.constant 0 : index
      %65 = vector.load %arg12[%c0_36, %c0_37] : memref<32x128xbf16, #tpu.memory_space<vmem>>, vector<32x128xbf16>
      tpu.vector_store %arg12[%c0_36, %c0_37], %64 {strides = array<i32>} : memref<32x128xbf16, #tpu.memory_space<vmem>>, vector<32x128xbf16>,
      %cst_38 = arith.constant 0.000000e+00 : f32
      %66 = vector.broadcast %cst_38 : f32 to vector<32x128xf32>
      %c0_39 = arith.constant 0 : index
      %c0_40 = arith.constant 0 : index
      %67 = vector.load %arg13[%c0_39, %c0_40] : memref<32x128xf32, #tpu.memory_space<vmem>>, vector<32x128xf32>
      tpu.vector_store %arg13[%c0_39, %c0_40], %66 {strides = array<i32>} : memref<32x128xf32, #tpu.memory_space<vmem>>, vector<32x128xf32>,
    } else {
    }
    %c0 = arith.constant 0 : index
    %c0_1 = arith.constant 0 : index
    %3 = vector.load %arg12[%c0, %c0_1] : memref<32x128xbf16, #tpu.memory_space<vmem>>, vector<32x128xbf16>
    %c0_2 = arith.constant 0 : index
    %c0_3 = arith.constant 0 : index
    %4 = vector.load %arg5[%c0_2, %c0_3] : memref<128x128xbf16, #tpu.memory_space<vmem>>, vector<128x128xbf16>
    %cst = arith.constant dense<0.000000e+00> : vector<32x128xf32>
    %5 = tpu.matmul %3, %4, %cst {dimension_numbers = #tpu.dot_dimension_numbers<[1], [0], [0], [1], [0, 0, 1, 1], [], []>} : vector<32x128xbf16>, vector<128x128xbf16>, vector<32x128xf32> -> vector<32x128xf32>
    %c0_4 = arith.constant 0 : index
    %c0_5 = arith.constant 0 : index
    %6 = vector.load %arg6[%c0_4, %c0_5] : memref<1x128xf32, #tpu.memory_space<vmem>>, vector<1x128xf32>
    %7 = vector.broadcast %6 : vector<1x128xf32> to vector<32x128xf32>
    %8 = arith.addf %5, %7 : vector<32x128xf32>
    %9 = arith.mulf %8, %8 : vector<32x128xf32>
    %10 = arith.mulf %8, %9 : vector<32x128xf32>
    %cst_6 = arith.constant 4.471500e-02 : f32
    %11 = vector.broadcast %cst_6 : f32 to vector<32x128xf32>
    %12 = arith.mulf %11, %10 : vector<32x128xf32>
    %13 = arith.addf %8, %12 : vector<32x128xf32>
    %cst_7 = arith.constant 0.797884583 : f32
    %14 = vector.broadcast %cst_7 : f32 to vector<32x128xf32>
    %15 = arith.mulf %14, %13 : vector<32x128xf32>
    %16 = math.tanh %15 : vector<32x128xf32>
    %cst_8 = arith.constant 1.000000e+00 : f32
    %17 = vector.broadcast %cst_8 : f32 to vector<32x128xf32>
    %18 = arith.addf %17, %16 : vector<32x128xf32>
    %cst_9 = arith.constant 5.000000e-01 : f32
    %19 = vector.broadcast %cst_9 : f32 to vector<32x128xf32>
    %20 = arith.mulf %19, %18 : vector<32x128xf32>
    %21 = arith.mulf %8, %20 : vector<32x128xf32>
    %c0_10 = arith.constant 0 : index
    %c0_11 = arith.constant 0 : index
    %22 = vector.load %arg13[%c0_10, %c0_11] : memref<32x128xf32, #tpu.memory_space<vmem>>, vector<32x128xf32>
    %23 = arith.truncf %21 : vector<32x128xf32> to vector<32x128xbf16>
    %c0_12 = arith.constant 0 : index
    %c0_13 = arith.constant 0 : index
    %24 = vector.load %arg7[%c0_12, %c0_13] : memref<128x128xbf16, #tpu.memory_space<vmem>>, vector<128x128xbf16>
    %cst_14 = arith.constant dense<0.000000e+00> : vector<32x128xf32>
    %25 = tpu.matmul %23, %24, %cst_14 {dimension_numbers = #tpu.dot_dimension_numbers<[1], [0], [0], [1], [0, 0, 1, 1], [], []>} : vector<32x128xbf16>, vector<128x128xbf16>, vector<32x128xf32> -> vector<32x128xf32>
    %26 = arith.addf %22, %25 : vector<32x128xf32>
    %c0_15 = arith.constant 0 : index
    %c0_16 = arith.constant 0 : index
    %27 = vector.load %arg13[%c0_15, %c0_16] : memref<32x128xf32, #tpu.memory_space<vmem>>, vector<32x128xf32>
    tpu.vector_store %arg13[%c0_15, %c0_16], %26 {strides = array<i32>} : memref<32x128xf32, #tpu.memory_space<vmem>>, vector<32x128xf32>,
    %c0_i32_17 = arith.constant 0 : i32
    %28 = arith.cmpi eq, %arg1, %c0_i32_17 : i32
    %29 = arith.extui %28 : i1 to i32
    %c0_i32_18 = arith.constant 0 : i32
    %30 = arith.cmpi ne, %29, %c0_i32_18 : i32
    scf.if %30 {
      %c0_19 = arith.constant 0 : index
      %c0_20 = arith.constant 0 : index
      %31 = vector.load %arg11[%c0_19, %c0_20] : memref<32x128xf32, #tpu.memory_space<vmem>>, vector<32x128xf32>
      %c0_21 = arith.constant 0 : index
      %c0_22 = arith.constant 0 : index
      %32 = vector.load %arg13[%c0_21, %c0_22] : memref<32x128xf32, #tpu.memory_space<vmem>>, vector<32x128xf32>
      %33 = arith.addf %31, %32 : vector<32x128xf32>
      %c3 = arith.constant 3 : index
      %c0_23 = arith.constant 0 : index
      %34 = vector.load %arg4[%c3, %c0_23] : memref<8x128xf32, #tpu.memory_space<vmem>>, vector<1x128xf32>
      %35 = vector.broadcast %34 : vector<1x128xf32> to vector<32x128xf32>
      %36 = arith.addf %33, %35 : vector<32x128xf32>
      %37 = arith.truncf %36 : vector<32x128xf32> to vector<32x128xbf16>
      %c0_24 = arith.constant 0 : index
      %c0_25 = arith.constant 0 : index
      %38 = vector.load %arg8[%c0_24, %c0_25] : memref<128x128xbf16, #tpu.memory_space<vmem>>, vector<128x128xbf16>
      %cst_26 = arith.constant dense<0.000000e+00> : vector<32x128xf32>
      %39 = tpu.matmul %37, %38, %cst_26 {dimension_numbers = #tpu.dot_dimension_numbers<[1], [0], [0], [1], [0, 0, 1, 1], [], []>} : vector<32x128xbf16>, vector<128x128xbf16>, vector<32x128xf32> -> vector<32x128xf32>
      %c0_27 = arith.constant 0 : index
      %c0_28 = arith.constant 0 : index
      %40 = vector.load %arg9[%c0_27, %c0_28] : memref<1x128xf32, #tpu.memory_space<vmem>>, vector<1x128xf32>
      %41 = vector.broadcast %40 : vector<1x128xf32> to vector<32x128xf32>
      %42 = arith.addf %39, %41 : vector<32x128xf32>
      %c0_29 = arith.constant 0 : index
      %c0_30 = arith.constant 0 : index
      %43 = vector.load %arg10[%c0_29, %c0_30] : memref<32x128xf32, #tpu.memory_space<vmem>>, vector<32x128xf32>
      tpu.vector_store %arg10[%c0_29, %c0_30], %42 {strides = array<i32>} : memref<32x128xf32, #tpu.memory_space<vmem>>, vector<32x128xf32>,
    } else {
    }
    return
  }
  func.func @transform_0(%arg0: i32, %arg1: i32) -> (i32, i32) {
    %c0_i32 = arith.constant 0 : i32
    %c0_i32_0 = arith.constant 0 : i32
    return %arg0, %c0_i32 : i32, i32
  }
  func.func @transform_1(%arg0: i32, %arg1: i32) -> (i32, i32) {
    %c0_i32 = arith.constant 0 : i32
    %c0_i32_0 = arith.constant 0 : i32
    %c0_i32_1 = arith.constant 0 : i32
    return %c0_i32, %c0_i32_0 : i32, i32
  }
  func.func @transform_2(%arg0: i32, %arg1: i32) -> (i32, i32) {
    %c0_i32 = arith.constant 0 : i32
    %c0_i32_0 = arith.constant 0 : i32
    %c0_i32_1 = arith.constant 0 : i32
    return %c0_i32, %c0_i32_0 : i32, i32
  }
  func.func @transform_3(%arg0: i32, %arg1: i32) -> (i32, i32) {
    %c0_i32 = arith.constant 0 : i32
    %c0_i32_0 = arith.constant 0 : i32
    return %c0_i32, %arg1 : i32, i32
  }
  func.func @transform_4(%arg0: i32, %arg1: i32) -> (i32, i32) {
    %c0_i32 = arith.constant 0 : i32
    %c0_i32_0 = arith.constant 0 : i32
    return %c0_i32, %arg1 : i32, i32
  }
  func.func @transform_5(%arg0: i32, %arg1: i32) -> (i32, i32) {
    %c0_i32 = arith.constant 0 : i32
    %c0_i32_0 = arith.constant 0 : i32
    return %arg1, %c0_i32 : i32, i32
  }
  func.func @transform_6(%arg0: i32, %arg1: i32) -> (i32, i32) {
    %c0_i32 = arith.constant 0 : i32
    %c0_i32_0 = arith.constant 0 : i32
    %c0_i32_1 = arith.constant 0 : i32
    return %c0_i32, %c0_i32_0 : i32, i32
  }
  func.func @transform_7(%arg0: i32, %arg1: i32) -> (i32, i32) {
    %c0_i32 = arith.constant 0 : i32
    %c0_i32_0 = arith.constant 0 : i32
    %c0_i32_1 = arith.constant 0 : i32
    return %c0_i32, %c0_i32_0 : i32, i32
  }
  func.func @transform_8(%arg0: i32, %arg1: i32) -> (i32, i32) {
    %c0_i32 = arith.constant 0 : i32
    %c0_i32_0 = arith.constant 0 : i32
    return %arg0, %c0_i32 : i32, i32
  }
}

</mosaic_0001>

<bundles_post_ra>
// kernel: tpu_custom_call.1
= control target key start
LH: loop header
LB: loop body
LE: loop exit
PB: predicated region body
PF: predicated region fallthrough
CT: control target
= control target key end

     0   :  { %13 = vsyncpa [#allocation6], 0  ;;  %s1340_s0 = inlined_call_operand.hbm [shape: bf16[32,128], index: 0, kind: input, shape index: {}]   ;;  %s1341_s1 = inlined_call_operand.hbm [shape: bf16[128,128], index: 1, kind: input, shape index: {}]   ;;  %s1342_s2 = inlined_call_operand.hbm [shape: f32[8,128], index: 2, kind: input, shape index: {}]   ;;  %s1343_s3 = inlined_call_operand.hbm [shape: bf16[128,128], index: 3, kind: input, shape index: {}]   ;;  %s1344_s4 = inlined_call_operand.vmem [shape: f32[1,128], index: 4, kind: input, shape index: {}]   ;;  %s1345_s5 = inlined_call_operand.hbm [shape: bf16[128,128], index: 5, kind: input, shape index: {}]   ;;  %s1346_s6 = inlined_call_operand.hbm [shape: bf16[128,128], index: 6, kind: input, shape index: {}]   ;;  %s1347_s7 = inlined_call_operand.vmem [shape: f32[1,128], index: 7, kind: input, shape index: {}]   ;;  %s1348_s8 = inlined_call_operand.hbm [shape: f32[32,128], index: 8, kind: output, shape index: {}]  }
   0x1   :  { %14 = vsyncpa [#allocation9], 0 }
   0x2   :  { %15 = vsyncpa [#allocation12], 0 }
   0x3   :  { %16 = vsyncpa [#allocation15], 0 }
   0x4   :  { %17 = vsyncpa [#allocation7], 0  ;;  %s1214_s27 = smov [#allocation8]   ;;  %s1215_s29 = smov [#allocation11]  }
   0x5   :  { %s35_s28 = sshll.u32 %s1214_s27, 4  ;;  %s57_s30 = sshll.u32 %s1215_s29, 4  ;;  %s36_s28 = int_to_ptr.vmem [resolvable:$true] %s35_s28  ;;  %s58_s30 = int_to_ptr.vmem [resolvable:$true] %s57_s30 }
   0x6   :  { %s1072_s9 = scalar_lea.vmem %s36_s28, 1024  ;;  %p1077_p1 = scmp.lt.s32.totalorder %s36_s28, %s36_s28 }
   0x7   :  { %p1073_p0 = scmp.ne.s32.totalorder %s36_s28, %s1072_s9  ;;  %p1078_p2 = scmp.lt.s32.totalorder %s1072_s9, %s1072_s9 }
   0x9   :  { %p1079_p3 = por %p1078_p2, %p1077_p1 }
   0xb   :  { %p1080_p4 = pnand %p1079_p3, %p1073_p0 }
   0xd   :  { %1083 = shalt.err (!%p1080_p4)
}
   0xe   :  { %s1216_s10 = smov 64   ;;  %s1217_s11 = smov 4  }
   0xf   :  { %41 = dma.hbm_to_vmem [thread:$0]  %s1341_s1, 1024, %s36_s28, [#allocation9], %s1216_s10, %s1216_s10, %s1217_s11  }
  0x10   :  { %s1092_s14 = scalar_lea.vmem %s58_s30, 1024  ;;  %p1097_p6 = scmp.lt.s32.totalorder %s58_s30, %s58_s30 }
  0x11   :  { %p1093_p5 = scmp.ne.s32.totalorder %s58_s30, %s1092_s14  ;;  %p1098_p7 = scmp.lt.s32.totalorder %s1092_s14, %s1092_s14 }
  0x13   :  { %p1099_p8 = por %p1098_p7, %p1097_p6 }
  0x15   :  { %p1100_p9 = pnand %p1099_p8, %p1093_p5 }
  0x17   :  { %1103 = shalt.err (!%p1100_p9)
}
  0x18   :  { %63 = dma.hbm_to_vmem [thread:$0]  %s1343_s3, 1024, %s58_s30, [#allocation12], %s1216_s10, %s1216_s10, %s1217_s11  }
  0x19   :  { %s1218_s17 = smov [#allocation5]   ;;  %s1219_s19 = smov [#allocation10]  }
  0x1a   :  { %s23_s18 = sshll.u32 %s1218_s17, 4  ;;  %s48_s20 = sshll.u32 %s1219_s19, 4  ;;  %s24_s18 = int_to_ptr.vmem [resolvable:$true] %s23_s18  ;;  %s49_s20 = int_to_ptr.vmem [resolvable:$true] %s48_s20 }
  0x1b   :  { %s1112_s1 = scalar_lea.vmem %s24_s18, 256  ;;  %p1117_p11 = scmp.lt.s32.totalorder %s24_s18, %s24_s18 }
  0x1c   :  { %p1113_p10 = scmp.ne.s32.totalorder %s24_s18, %s1112_s1  ;;  %p1118_p12 = scmp.lt.s32.totalorder %s1112_s1, %s1112_s1 }
  0x1e   :  { %p1119_p13 = por %p1118_p12, %p1117_p11 }
  0x20   :  { %p1120_p0 = pnand %p1119_p13, %p1113_p10 }
  0x22   :  { %1123 = shalt.err (!%p1120_p0)
}
  0x23   :  { %29 = dma.hbm_to_vmem [thread:$0]  %s1340_s0, 256, %s24_s18, [#allocation6], %s1216_s10, %s1216_s10, %s1217_s11  }
  0x24   :  { %s1132_s3 = scalar_lea.vmem %s49_s20, 128  ;;  %p1137_p2 = scmp.lt.s32.totalorder %s49_s20, %s49_s20 }
  0x25   :  { %p1133_p1 = scmp.ne.s32.totalorder %s49_s20, %s1132_s3  ;;  %p1138_p3 = scmp.lt.s32.totalorder %s1132_s3, %s1132_s3 }
  0x27   :  { %p1139_p4 = por %p1138_p3, %p1137_p2 }
  0x29   :  { %p1140_p5 = pnand %p1139_p4, %p1133_p1 }
  0x2b   :  { %1143 = shalt.err (!%p1140_p5)
}
  0x2c   :  { %51 = dma.hbm_to_vmem [thread:$0]  %s1342_s2, 128, %s49_s20, [#allocation9]  }
  0x2d   :  { %s1220_s25 = smov [#allocation13]   ;;  %s1221_s27 = smov [#allocation14]  }
  0x2e   :  { %s71_s26 = sshll.u32 %s1220_s25, 4  ;;  %s83_s28 = sshll.u32 %s1221_s27, 4  ;;  %s72_s26 = int_to_ptr.vmem [resolvable:$true] %s71_s26  ;;  %s84_s28 = int_to_ptr.vmem [resolvable:$true] %s83_s28 }
  0x2f   :  { %s1152_s29 = scalar_lea.vmem %s72_s26, 1024  ;;  %p1157_p7 = scmp.lt.s32.totalorder %s72_s26, %s72_s26 }
  0x30   :  { %p1153_p6 = scmp.ne.s32.totalorder %s72_s26, %s1152_s29  ;;  %p1158_p8 = scmp.lt.s32.totalorder %s1152_s29, %s1152_s29 }
  0x32   :  { %p1159_p9 = por %p1158_p8, %p1157_p7 }
  0x34   :  { %p1160_p10 = pnand %p1159_p9, %p1153_p6 }
  0x36   :  { %1163 = shalt.err (!%p1160_p10)
}
  0x37   :  { %77 = dma.hbm_to_vmem [thread:$0]  %s1345_s5, 1024, %s72_s26, [#allocation12], %s1216_s10, %s1216_s10, %s1217_s11  }
  0x38   :  { %s1172_s2 = scalar_lea.vmem %s84_s28, 1024  ;;  %p1177_p12 = scmp.lt.s32.totalorder %s84_s28, %s84_s28 }
  0x39   :  { %p1173_p11 = scmp.ne.s32.totalorder %s84_s28, %s1172_s2  ;;  %p1178_p13 = scmp.lt.s32.totalorder %s1172_s2, %s1172_s2 }
  0x3b   :  { %p1179_p0 = por %p1178_p13, %p1177_p12 }
  0x3d   :  { %p1180_p1 = pnand %p1179_p0, %p1173_p11 }
  0x3f   :  { %1183 = shalt.err (!%p1180_p1)
}
  0x40   :  { %89 = dma.hbm_to_vmem [thread:$0]  %s1346_s6, 1024, %s84_s28, [#allocation15], %s1216_s10, %s1216_s10, %s1217_s11  }
  0x41   :  { %1204 = dma.done.wait [#allocation6], 256  }
  0x42   :  { %1205 = vsyncadd [#allocation6], 4294967040 }
  0x43   :  { %1206 = dma.done.wait [#allocation9], 1152  }
  0x44   :  { %1207 = vsyncadd [#allocation9], 4294966144 }
  0x45   :  { %1208 = dma.done.wait [#allocation12], 2048  }
  0x46   :  { %1209 = vsyncadd [#allocation12], 4294965248 }
  0x47   :  { %1210 = dma.done.wait [#allocation15], 1024  }
  0x48   :  { %1211 = vsyncadd [#allocation15], 4294966272  ;;  %v1012_v0 = vld [vmem:[#allocation8 + $0x38] sm:$0xff]   ;;  %v1013_v1 = vld [vmem:[#allocation8 + $0x30] sm:$0xff]   ;;  %s1222_s11 = smov [#allocation16]  }
  0x49   :  { %921 = vmatprep.subr.bf16.mxu0 %v1012_v0  ;;  %v1014_v2 = vld [vmem:[#allocation8 + $0x28] sm:$0xff]   ;;  %v1015_v3 = vld [vmem:[#allocation8 + $0x20] sm:$0xff]   ;;  %v1020_v4 = vld [vmem:[#allocation5] sm:$0xff]   ;;  %s805_s13 = sshll.u32 %s1222_s11, 4  ;;  %s806_s13 = int_to_ptr.vmem [resolvable:$true] %s805_s13 }
  0x4a   :  { %922 = vmatpush3.bf16.msra.mxu0 %v1012_v0  ;;  %v1016_v5 = vld [vmem:[#allocation8 + $0x18] sm:$0xff]   ;;  %937 = vmatprep.mubr.bf16.mxu0 %v1020_v4  ;;  %v1017_v6 = vld [vmem:[#allocation8 + $0x10] sm:$0xff]   ;;  %v1018_v7 = vld [vmem:[#allocation8 + $0x8] sm:$0xff]   ;;  %s1184_s14 = scalar_lea.vmem %s806_s13, 512  ;;  %p1189_p3 = scmp.lt.s32.totalorder %s806_s13, %s806_s13 }
  0x4b   :  { %923 = vmatprep.subr.bf16.mxu0 %v1013_v1  ;;  %v1019_v8 = vld [vmem:[#allocation8] sm:$0xff]   ;;  %v1021_v9 = vld [vmem:[#allocation5 + $0x8] sm:$0xff]   ;;  %v1024_v25 = vld [vmem:[#allocation11 + $0x28] sm:$0xff]   ;;  %p1185_p2 = scmp.ne.s32.totalorder %s806_s13, %s1184_s14  ;;  %p1190_p4 = scmp.lt.s32.totalorder %s1184_s14, %s1184_s14 }
  0x4c   :  { %v820_v10 = vld [vmem:[#allocation10] ss:$0 sm:$0xff]  ;;  %v1023_v24 = vld [vmem:[#allocation11 + $0x30] sm:$0xff]   ;;  %v1025_v26 = vld [vmem:[#allocation11 + $0x20] sm:$0xff]  }
  0x4d   :  { %v1022_v23 = vld [vmem:[#allocation11 + $0x38] sm:$0xff]   ;;  %v1027_v28 = vld [vmem:[#allocation11 + $0x10] sm:$0xff]   ;;  %v1028_v29 = vld [vmem:[#allocation11 + $0x8] sm:$0xff]   ;;  %p1191_p5 = por %p1190_p4, %p1189_p3 }
  0x4e   :  { %924 = vmatpush3.bf16.msra.mxu0 %v1013_v1  ;;  %941 = vmatprep.subr.bf16.mxu1 %v1022_v23  ;;  %v1026_v27 = vld [vmem:[#allocation11 + $0x18] sm:$0xff]   ;;  %v1029_v30 = vld [vmem:[#allocation11] sm:$0xff]  }
  0x4f   :  { %925 = vmatprep.subr.bf16.mxu0 %v1014_v2  ;;  %942 = vmatpush3.bf16.msra.mxu1 %v1022_v23  ;;  %p1192_p6 = pnand %p1191_p5, %p1185_p2 }
  0x50   :  { %943 = vmatprep.subr.bf16.mxu1 %v1023_v24 }
  0x52   :  { %926 = vmatpush3.bf16.msra.mxu0 %v1014_v2  ;;  %v831_v2 = vld [vmem:[#allocation10 + $0x1] ss:$0 sm:$0xff] }
  0x53   :  { %927 = vmatprep.subr.bf16.mxu0 %v1015_v3  ;;  %944 = vmatpush3.bf16.msra.mxu1 %v1023_v24 }
  0x54   :  { %945 = vmatprep.subr.bf16.mxu1 %v1024_v25 }
  0x56   :  { %928 = vmatpush3.bf16.msra.mxu0 %v1015_v3 }
  0x57   :  { %929 = vmatprep.subr.bf16.mxu0 %v1016_v5  ;;  %946 = vmatpush3.bf16.msra.mxu1 %v1024_v25 }
  0x58   :  { %947 = vmatprep.subr.bf16.mxu1 %v1025_v26 }
  0x5a   :  { %930 = vmatpush3.bf16.msra.mxu0 %v1016_v5 }
  0x5b   :  { %931 = vmatprep.subr.bf16.mxu0 %v1017_v6  ;;  %948 = vmatpush3.bf16.msra.mxu1 %v1025_v26 }
  0x5c   :  { %949 = vmatprep.subr.bf16.mxu1 %v1026_v27 }
  0x5e   :  { %932 = vmatpush3.bf16.msra.mxu0 %v1017_v6 }
  0x5f   :  { %933 = vmatprep.subr.bf16.mxu0 %v1018_v7  ;;  %950 = vmatpush3.bf16.msra.mxu1 %v1026_v27 }
  0x60   :  { %951 = vmatprep.subr.bf16.mxu1 %v1027_v28 }
  0x62   :  { %934 = vmatpush3.bf16.msra.mxu0 %v1018_v7 }
  0x63   :  { %935 = vmatprep.subr.bf16.mxu0 %v1019_v8  ;;  %952 = vmatpush3.bf16.msra.mxu1 %v1027_v28 }
  0x64   :  { %953 = vmatprep.subr.bf16.mxu1 %v1028_v29 }
  0x66   :  { %936 = vmatpush3.bf16.msra.mxu0 %v1019_v8 }
  0x67   :  { %954 = vmatpush3.bf16.msra.mxu1 %v1028_v29  ;;  %v1032_v29 = vld [vmem:[#allocation13 + $0x38] sm:$0xff]  }
  0x68   :  { %955 = vmatprep.subr.bf16.mxu1 %v1029_v30  ;;  %961 = vmatprep.subr.bf16.mxu0 %v1032_v29 }
  0x69   :  { %938 = vmatmul.mubr.bf16.vlgmr.msra.gmra.mxu0 %v1021_v9 }
  0x6a   :  { %962 = vmatpush3.bf16.msra.mxu0 %v1032_v29  ;;  %v1045_v29 = vld [vmem:[#allocation14 + $0x10] sm:$0xff]  }
  0x6b   :  { %956 = vmatpush3.bf16.msra.mxu1 %v1029_v30  ;;  %v1033_v30 = vld [vmem:[#allocation13 + $0x30] sm:$0xff]  }
  0x6c   :  { %963 = vmatprep.subr.bf16.mxu0 %v1033_v30 }
  0x6e   :  { %964 = vmatpush3.bf16.msra.mxu0 %v1033_v30  ;;  %v1046_v30 = vld [vmem:[#allocation14 + $0x8] sm:$0xff]  }
 0x129   :  { %v939_v11 = vpop.f32.mrf.mxu0 }
 0x12a   :  { %v1303_v12 = vadd.f32 %v939_v11, %v820_v10  ;;  %v832_v11 = vld [vmem:[#allocation10 + $0x2] ss:$0 sm:$0xff] }
 0x12b   :  { %v234_v13 = vpop.f32.mrf.mxu0 }
 0x12c   :  { %v1305_v14 = vadd.f32 %v820_v10, %v234_v13  ;;  %253 = vadd.xlane.f32.xlu1 %v1303_v12  ;;  %v263_v22 = vmul.f32 %v1303_v12, %v1303_v12 }
 0x12d   :  { %v940_v15 = vpop.f32.mrf.mxu0 }
 0x12e   :  { %v1308_v16 = vadd.f32 %v940_v15, %v820_v10  ;;  %249 = vadd.xlane.f32.xlu0 %v1305_v14  ;;  %v261_v19 = vmul.f32 %v1305_v14, %v1305_v14 }
 0x12f   :  { %v237_v17 = vpop.f32.mrf.mxu0 }
 0x130   :  { %v1311_v18 = vadd.f32 %v820_v10, %v237_v17  ;;  %255 = vadd.xlane.f32.xlu1 %v1308_v16  ;;  %v264_v21 = vmul.f32 %v1308_v16, %v1308_v16 }
 0x132   :  { %265 = vadd.xlane.f32.xlu0 %v261_v19  ;;  %v262_v20 = vmul.f32 %v1311_v18, %v1311_v18 }
 0x134   :  { %267 = vadd.xlane.f32.xlu1 %v262_v20 }
 0x136   :  { %251 = vadd.xlane.f32.xlu0 %v1311_v18 }
 0x138   :  { %271 = vadd.xlane.f32.xlu1 %v264_v21 }
 0x13a   :  { %269 = vadd.xlane.f32.xlu0 %v263_v22 }
 0x1b5   :  { %v254_v31 = vpop.xlane.xlu1 %253 }
 0x1b6   :  { %v259_v41 = vmul.f32 0.03125, %v254_v31  ;;  %v1034_v31 = vld [vmem:[#allocation13 + $0x28] sm:$0xff]  }
 0x1b7   :  { %v250_v32 = vpop.xlane.xlu0 %249  ;;  %965 = vmatprep.subr.bf16.mxu0 %v1034_v31 }
 0x1b8   :  { %v257_v33 = vmul.f32 0.03125, %v250_v32  ;;  %v279_v51 = vmul.f32 %v259_v41, %v259_v41  ;;  %v291_v7 = vsub.f32 %v1303_v12, %v259_v41  ;;  %966 = vmatpush3.bf16.msra.mxu0 %v1034_v31  ;;  %v1035_v32 = vld [vmem:[#allocation13 + $0x20] sm:$0xff]   ;;  %v1044_v41 = vld [vmem:[#allocation14 + $0x18] sm:$0xff]  }
 0x1b9   :  { %v256_v34 = vpop.xlane.xlu1 %255  ;;  %967 = vmatprep.subr.bf16.mxu0 %v1035_v32  ;;  %v1047_v31 = vld [vmem:[#allocation14] sm:$0xff]  }
 0x1ba   :  { %v277_v36 = vmul.f32 %v257_v33, %v257_v33  ;;  %v260_v38 = vmul.f32 0.03125, %v256_v34  ;;  %v289_v0 = vsub.f32 %v1305_v14, %v257_v33  ;;  %v1036_v33 = vld [vmem:[#allocation13 + $0x18] sm:$0xff]   ;;  %v1037_v34 = vld [vmem:[#allocation13 + $0x10] sm:$0xff]  }
 0x1bb   :  { %v266_v35 = vpop.xlane.xlu0 %265 }
 0x1bc   :  { %v273_v37 = vmul.f32 0.03125, %v266_v35  ;;  %v280_v45 = vmul.f32 %v260_v38, %v260_v38  ;;  %v292_v5 = vsub.f32 %v1308_v16, %v260_v38  ;;  %968 = vmatpush3.bf16.msra.mxu0 %v1035_v32  ;;  %v1038_v35 = vld [vmem:[#allocation13 + $0x8] sm:$0xff]   ;;  %v1041_v38 = vld [vmem:[#allocation14 + $0x30] sm:$0xff]  }
 0x1bd   :  { %v268_v39 = vpop.xlane.xlu1 %267  ;;  %969 = vmatprep.subr.bf16.mxu0 %v1036_v33 }
 0x1be   :  { %v281_v40 = vsub.f32 %v273_v37, %v277_v36  ;;  %v274_v48 = vmul.f32 0.03125, %v268_v39  ;;  %v1039_v36 = vld [vmem:[#allocation13] sm:$0xff]   ;;  %v1040_v37 = vld [vmem:[#allocation14 + $0x38] sm:$0xff]   ;;  %v1042_v39 = vld [vmem:[#allocation14 + $0x28] sm:$0xff]  }
 0x1bf   :  { %v252_v42 = vpop.xlane.xlu0 %251  ;;  %981 = vmatprep.subr.bf16.mxu1 %v1040_v37 }
 0x1c0   :  { %v285_v43 = vmax.f32 %v281_v40, 0.0  ;;  %v258_v44 = vmul.f32 0.03125, %v252_v42  ;;  %970 = vmatpush3.bf16.msra.mxu0 %v1036_v33  ;;  %v1043_v40 = vld [vmem:[#allocation14 + $0x20] sm:$0xff]   ;;  %v837_v42 = vld [vmem:[%s1344_s4] ss:$0 sm:$0xff] }
 0x1c1   :  { %v272_v46 = vpop.xlane.xlu1 %271  ;;  %971 = vmatprep.subr.bf16.mxu0 %v1037_v34 }
 0x1c2   :  { %v293_v47 = vadd.f32 1e-06, %v285_v43  ;;  %v278_v49 = vmul.f32 %v258_v44, %v258_v44  ;;  %v276_v50 = vmul.f32 0.03125, %v272_v46  ;;  %v290_v3 = vsub.f32 %v1311_v18, %v258_v44 }
 0x1c3   :  { %v270_v52 = vpop.xlane.xlu0 %269 }
 0x1c4   :  { %1048 = vrsqrt.f32 %v293_v47  ;;  %v282_v53 = vsub.f32 %v274_v48, %v278_v49  ;;  %v284_v54 = vsub.f32 %v276_v50, %v280_v45  ;;  %v275_v55 = vmul.f32 0.03125, %v270_v52  ;;  %972 = vmatpush3.bf16.msra.mxu0 %v1037_v34 }
 0x1c5   :  { %973 = vmatprep.subr.bf16.mxu0 %v1038_v35 }
 0x1c6   :  { %v286_v56 = vmax.f32 %v282_v53, 0.0  ;;  %v288_v57 = vmax.f32 %v284_v54, 0.0  ;;  %v283_v58 = vsub.f32 %v275_v55, %v279_v51 }
 0x1c8   :  { %v294_v59 = vadd.f32 1e-06, %v286_v56  ;;  %v296_v60 = vadd.f32 1e-06, %v288_v57  ;;  %v287_v61 = vmax.f32 %v283_v58, 0.0  ;;  %974 = vmatpush3.bf16.msra.mxu0 %v1038_v35 }
 0x1c9   :  { %975 = vmatprep.subr.bf16.mxu0 %v1039_v36 }
 0x1ca   :  { %1050 = vrsqrt.f32 %v294_v59  ;;  %v295_v62 = vadd.f32 1e-06, %v287_v61 }
 0x1cb   :  { %1052 = vrsqrt.f32 %v296_v60 }
 0x1cc   :  { %1054 = vrsqrt.f32 %v295_v62  ;;  %976 = vmatpush3.bf16.msra.mxu0 %v1039_v36 }
 0x1d1   :  { %v1049_v63 = vpop.eup %1048 }
 0x1d2   :  { %v301_v1 = vmul.f32 %v1049_v63, %v289_v0 }
 0x1d4   :  { %v310_v8 = vmul.f32 %v831_v2, %v301_v1 }
 0x1d6   :  { %v319_v20 = vadd.f32 %v832_v11, %v310_v8 }
 0x1d7   :  { %v1051_v4 = vpop.eup %1050 }
 0x1d8   :  { %v1053_v6 = vpop.eup %1052  ;;  %v302_v9 = vmul.f32 %v1051_v4, %v290_v3 }
 0x1d9   :  { %v1055_v10 = vpop.eup %1054  ;;  %v304_v13 = vmul.f32 %v1053_v6, %v292_v5 }
 0x1da   :  { %v311_v15 = vmul.f32 %v831_v2, %v302_v9  ;;  %v303_v17 = vmul.f32 %v1055_v10, %v291_v7 }
 0x1db   :  { %v313_v19 = vmul.f32 %v831_v2, %v304_v13 }
 0x1dc   :  { %v320_v21 = vadd.f32 %v832_v11, %v311_v15  ;;  %v312_v22 = vmul.f32 %v831_v2, %v303_v17 }
 0x1dd   :  { %v322_v24 = vadd.f32 %v832_v11, %v313_v19 }
 0x1de   :  { %v873_v23 = vpack.c.bf16 %v320_v21, %v319_v20  ;;  %v321_v25 = vadd.f32 %v832_v11, %v312_v22 }
 0x1e0   :  { %874 = vst [vmem:[#allocation3] sm:$0xff] %v873_v23   ;;  %v878_v26 = vpack.c.bf16 %v322_v24, %v321_v25 }
 0x1e2   :  { %880 = vst [vmem:[#allocation3 + $0x8] sm:$0xff] %v878_v26  }
 0x1e7   :  { %v1030_v27 = vld [vmem:[#allocation3] sm:$0xff]  }
 0x1e8   :  { %957 = vmatprep.mubr.bf16.mxu1 %v1030_v27 }
 0x1e9   :  { %v1031_v28 = vld [vmem:[#allocation3 + $0x8] sm:$0xff]  }
 0x1ea   :  { %958 = vmatmul.mubr.bf16.vlgmr.msra.gmra.mxu1 %v1031_v28 }
 0x1eb   :  { %982 = vmatpush3.bf16.msra.mxu1 %v1040_v37 }
 0x1ec   :  { %983 = vmatprep.subr.bf16.mxu1 %v1041_v38 }
 0x1ef   :  { %984 = vmatpush3.bf16.msra.mxu1 %v1041_v38 }
 0x1f0   :  { %985 = vmatprep.subr.bf16.mxu1 %v1042_v39 }
 0x1f3   :  { %986 = vmatpush3.bf16.msra.mxu1 %v1042_v39  ;;  %v856_v39 = vld [vmem:[#allocation10 + $0x3] ss:$0 sm:$0xff] }
 0x1f4   :  { %987 = vmatprep.subr.bf16.mxu1 %v1043_v40 }
 0x1f7   :  { %988 = vmatpush3.bf16.msra.mxu1 %v1043_v40 }
 0x1f8   :  { %989 = vmatprep.subr.bf16.mxu1 %v1044_v41 }
 0x1fb   :  { %990 = vmatpush3.bf16.msra.mxu1 %v1044_v41 }
 0x1fc   :  { %991 = vmatprep.subr.bf16.mxu1 %v1045_v29 }
 0x1ff   :  { %992 = vmatpush3.bf16.msra.mxu1 %v1045_v29 }
 0x200   :  { %993 = vmatprep.subr.bf16.mxu1 %v1046_v30 }
 0x203   :  { %994 = vmatpush3.bf16.msra.mxu1 %v1046_v30 }
 0x204   :  { %995 = vmatprep.subr.bf16.mxu1 %v1047_v31 }
 0x207   :  { %996 = vmatpush3.bf16.msra.mxu1 %v1047_v31 }
 0x2aa   :  { %v959_v43 = vpop.f32.mrf.mxu1 }
 0x2ab   :  { %v481_v44 = vadd.f32 %v959_v43, %v837_v42 }
 0x2ac   :  { %v472_v45 = vpop.f32.mrf.mxu1 }
 0x2ad   :  { %v489_v46 = vmul.f32 %v481_v44, %v481_v44  ;;  %v473_v47 = vadd.f32 %v837_v42, %v472_v45 }
 0x2ae   :  { %v960_v48 = vpop.f32.mrf.mxu1 }
 0x2af   :  { %v493_v49 = vmul.f32 %v489_v46, %v481_v44  ;;  %v487_v50 = vmul.f32 %v473_v47, %v473_v47  ;;  %v484_v51 = vadd.f32 %v960_v48, %v837_v42 }
 0x2b0   :  { %v475_v52 = vpop.f32.mrf.mxu1 }
 0x2b1   :  { %v497_v53 = vmul.f32 0.044715, %v493_v49  ;;  %v491_v54 = vmul.f32 %v487_v50, %v473_v47  ;;  %v490_v55 = vmul.f32 %v484_v51, %v484_v51  ;;  %v476_v56 = vadd.f32 %v837_v42, %v475_v52 }
 0x2b3   :  { %v501_v57 = vadd.f32 %v497_v53, %v481_v44  ;;  %v495_v58 = vmul.f32 0.044715, %v491_v54  ;;  %v494_v59 = vmul.f32 %v490_v55, %v484_v51  ;;  %v488_v60 = vmul.f32 %v476_v56, %v476_v56 }
 0x2b5   :  { %v505_v61 = vmul.f32 0.7978846, %v501_v57  ;;  %v499_v62 = vadd.f32 %v495_v58, %v473_v47  ;;  %v498_v63 = vmul.f32 0.044715, %v494_v59  ;;  %v492_v0 = vmul.f32 %v488_v60, %v476_v56 }
 0x2b7   :  { %v503_v1 = vmul.f32 0.7978846, %v499_v62  ;;  %v502_v2 = vadd.f32 %v498_v63, %v484_v51  ;;  %v496_v3 = vmul.f32 0.044715, %v492_v0  ;;  %1056 = vtanh.f32 %v505_v61 }
 0x2b9   :  { %1058 = vtanh.f32 %v503_v1  ;;  %v506_v4 = vmul.f32 0.7978846, %v502_v2  ;;  %v500_v5 = vadd.f32 %v496_v3, %v476_v56 }
 0x2bb   :  { %1060 = vtanh.f32 %v506_v4  ;;  %v504_v6 = vmul.f32 0.7978846, %v500_v5 }
 0x2bd   :  { %1062 = vtanh.f32 %v504_v6 }
 0x2c4   :  { %v1057_v7 = vpop.eup %1056 }
 0x2c5   :  { %v513_v11 = vadd.f32 1.0, %v1057_v7 }
 0x2c6   :  { %v1059_v8 = vpop.eup %1058 }
 0x2c7   :  { %v511_v9 = vadd.f32 1.0, %v1059_v8  ;;  %v517_v21 = vmul.f32 0.5, %v513_v11 }
 0x2c8   :  { %v1061_v10 = vpop.eup %1060 }
 0x2c9   :  { %v514_v13 = vadd.f32 1.0, %v1061_v10  ;;  %v515_v20 = vmul.f32 0.5, %v511_v9  ;;  %v521_v26 = vmul.f32 %v517_v21, %v481_v44 }
 0x2ca   :  { %v1063_v15 = vpop.eup %1062 }
 0x2cb   :  { %v518_v17 = vmul.f32 0.5, %v514_v13  ;;  %v512_v19 = vadd.f32 1.0, %v1063_v15  ;;  %v519_v24 = vmul.f32 %v515_v20, %v473_v47 }
 0x2cd   :  { %v516_v22 = vmul.f32 0.5, %v512_v19  ;;  %v522_v23 = vmul.f32 %v518_v17, %v484_v51 }
 0x2cf   :  { %v520_v25 = vmul.f32 %v516_v22, %v476_v56  ;;  %v528_v28 = vpack.c.bf16 %v522_v23, %v521_v26 }
 0x2d1   :  { %v527_v27 = vpack.c.bf16 %v520_v25, %v519_v24 }
 0x2d3   :  { %977 = vmatprep.mubr.bf16.mxu0 %v527_v27 }
 0x2d4   :  { %978 = vmatmul.mubr.bf16.vlgmr.msra.gmra.mxu0 %v528_v28 }
 0x394   :  { %v979_v32 = vpop.f32.mrf.mxu0 }
 0x395   :  { %v663_v37 = vadd.f32 %v979_v32, %v1303_v12 }
 0x396   :  { %v627_v33 = vpop.f32.mrf.mxu0 }
 0x397   :  { %v661_v35 = vadd.f32 %v627_v33, %v1305_v14  ;;  %v672_v44 = vadd.f32 %v856_v39, %v663_v37  ;;  %v857_v14 = vld [vmem:[%s1347_s7] ss:$0 sm:$0xff] }
 0x398   :  { %v980_v34 = vpop.f32.mrf.mxu0 }
 0x399   :  { %v664_v36 = vadd.f32 %v980_v34, %v1308_v16  ;;  %v670_v42 = vadd.f32 %v856_v39, %v661_v35 }
 0x39a   :  { %v630_v38 = vpop.f32.mrf.mxu0 }
 0x39b   :  { %v662_v40 = vadd.f32 %v630_v38, %v1311_v18  ;;  %v673_v41 = vadd.f32 %v856_v39, %v664_v36 }
 0x39d   :  { %v671_v43 = vadd.f32 %v856_v39, %v662_v40  ;;  %v675_v46 = vpack.c.bf16 %v673_v41, %v672_v44 }
 0x39f   :  { %v674_v45 = vpack.c.bf16 %v671_v43, %v670_v42 }
 0x3a1   :  { %997 = vmatprep.mubr.bf16.mxu1 %v674_v45 }
 0x3a2   :  { %998 = vmatmul.mubr.bf16.vlgmr.msra.gmra.mxu1 %v675_v46 }
 0x462   :  { %v999_v47 = vpop.f32.mrf.mxu1 }
 0x463   :  { %v790_v16 = vadd.f32 %v999_v47, %v857_v14 }
 0x464   :  { %v781_v48 = vpop.f32.mrf.mxu1 }
 0x465   :  { %798 = vst [vmem:[#allocation16 + $0x10] sm:$0xff] %v790_v16  ;;  %v782_v12 = vadd.f32 %v857_v14, %v781_v48 }
 0x466   :  { %v1000_v49 = vpop.f32.mrf.mxu1 }
 0x467   :  { %796 = vst [vmem:[#allocation16] sm:$0xff] %v782_v12  ;;  %v793_v18 = vadd.f32 %v1000_v49, %v857_v14 }
 0x468   :  { %v784_v50 = vpop.f32.mrf.mxu1 }
 0x469   :  { %799 = vst [vmem:[#allocation16 + $0x18] sm:$0xff] %v793_v18  ;;  %v785_v51 = vadd.f32 %v857_v14, %v784_v50 }
 0x46b   :  { %797 = vst [vmem:[#allocation16 + $0x8] sm:$0xff] %v785_v51 }
 0x46c   :  { %1195 = shalt.err (!%p1192_p6)
}
 0x46d   :  { %s1223_s7 = smov 128   ;;  %s1224_s15 = smov 8  }
 0x46e   :  { %811 = dma.vmem_to_hbm [thread:$0]  %s806_s13, 512, %s1348_s8, [#allocation7], %s1223_s7, %s1223_s7, %s1224_s15  }
 0x46f   :  { %1212 = dma.done.wait [#allocation7], 512  }
 0x470   :  { %1213 = vsyncadd [#allocation7], 4294966784 }
 0x471   :  { %815 = vsyncpa [#allocation6], 1 }
 0x472   :  { %816 = vsyncpa [#allocation9], 1 }
 0x473   :  { %817 = vsyncpa [#allocation12], 1 }
 0x474   :  { %818 = vsyncpa [#allocation15], 1 }
 0x475   :  { %819 = vsyncpa [#allocation7], 1 }

</bundles_post_ra>
